<compile_context>
chip_gen: v7x
topology: tpu7x:2x2x1
jax: 0.10.0
libtpu: 0.0.40
codegen_flags: <defaults>
</compile_context>

<pallas_src>
import math
import jax
import jax.numpy as jnp
from jax.experimental import pallas as pl
from jax.experimental.pallas import tpu as pltpu


def _round_up(x, m):
    return (x + m - 1) // m * m


def _mlp_transposed(h, w1t_ref, b1_ref, w2t_ref, b2_ref, w3t_ref, b3_ref, o_ref):
    """Shared 3-layer MLP on channels-on-sublanes activations.

    h: (C_in, tile_e) bf16.  Every activation stays (C, tile_e): the lane axis
    is fully dense for the MXU result pops and the final store is unmasked.
    Matmul operands are bf16, accumulation f32; bias/ReLU/sigmoid in f32.
    Dropout = identity (eval mode)."""
    # layer 1: (H, tile_e) = w1^T (H, C_in) @ h (C_in, tile_e)
    z = jnp.dot(w1t_ref[...], h, preferred_element_type=jnp.float32) + b1_ref[...]
    h = jnp.maximum(z, 0.0).astype(jnp.bfloat16)
    # layer 2: (H, tile_e) = w2^T (H, H) @ h
    z = jnp.dot(w2t_ref[...], h, preferred_element_type=jnp.float32) + b2_ref[...]
    h = jnp.maximum(z, 0.0).astype(jnp.bfloat16)
    # output layer: (C_out, tile_e) = w3^T (C_out, H) @ h
    z = jnp.dot(w3t_ref[...], h, preferred_element_type=jnp.float32) + b3_ref[...]
    o_ref[...] = jax.nn.sigmoid(z).astype(o_ref.dtype)


def _linkpred_gather_kernel(edges_ref, xt_ref,
                            w1t_ref, b1_ref, w2t_ref, b2_ref, w3t_ref, b3_ref,
                            o_ref):
    """In-kernel gather path: edges_ref (2, tile_e) i32, xt_ref (C_in, N_pad) bf16."""
    n_pad = xt_ref.shape[1]
    tile_e = edges_ref.shape[1]
    node_ids = jax.lax.broadcasted_iota(jnp.int32, (n_pad, tile_e), 0)
    # One-hot MXU gather: x_i^T = x^T @ onehot(src), x_j^T = x^T @ onehot(dst).
    onehot_src = jnp.where(node_ids == edges_ref[0:1, :], 1.0, 0.0).astype(jnp.bfloat16)
    onehot_dst = jnp.where(node_ids == edges_ref[1:2, :], 1.0, 0.0).astype(jnp.bfloat16)
    xt = xt_ref[...]                                                 # (C_in, N_pad) bf16
    xi = jnp.dot(xt, onehot_src, preferred_element_type=jnp.float32)  # (C_in, tile_e) f32
    xj = jnp.dot(xt, onehot_dst, preferred_element_type=jnp.float32)
    h0 = (xi * xj).astype(jnp.bfloat16)
    _mlp_transposed(h0, w1t_ref, b1_ref, w2t_ref, b2_ref, w3t_ref, b3_ref, o_ref)


def _linkpred_mlp_kernel(h0_ref,
                         w1t_ref, b1_ref, w2t_ref, b2_ref, w3t_ref, b3_ref,
                         o_ref):
    """Fallback path: h0_ref is the pre-gathered product (C_in, tile_e) bf16."""
    _mlp_transposed(h0_ref[...], w1t_ref, b1_ref, w2t_ref, b2_ref, w3t_ref, b3_ref, o_ref)


def link_predictor_forward(x, edges, params, *, tile_e=8192, gather_in_kernel=None):
    """x: [N, C_in] f32, edges: [2, E] i32, params: dict of weights/biases."""
    w1, b1, w2, b2, w3, b3 = (params["w1"], params["b1"], params["w2"],
                              params["b2"], params["w3"], params["b3"])
    N, C_in = x.shape
    H = w1.shape[1]
    C_out = w3.shape[1]
    E = edges.shape[1]

    assert tile_e % 128 == 0, "tile_e must be a multiple of 128"
    # --- edge-axis tiling ----------------------------------------------------
    e_128 = max(128, _round_up(E, 128))
    tile_e = min(tile_e, e_128)
    # Prefer >= 2 grid steps so v7x's two TensorCores both get work
    # (harmless on single-TC v5e/v6e).
    if e_128 // tile_e < 2 and e_128 >= 256:
        tile_e = _round_up(e_128 // 2, 128)
    E_pad = _round_up(E, tile_e)
    grid = (E_pad // tile_e,)

    # Pad *indices* (8 B/edge) instead of gathered feature rows (128 B/edge).
    edges_pad = jnp.pad(edges.astype(jnp.int32), ((0, 0), (0, E_pad - E)))

    # bf16 operands for every matmul (MXU-native on all generations), stored
    # transposed for the (C, tile_e) layout; biases column-shaped in f32.
    w1t = w1.T.astype(jnp.bfloat16)                     # (H, C_in)
    w2t = w2.T.astype(jnp.bfloat16)                     # (H, H)
    w3t = w3.T.astype(jnp.bfloat16)                     # (C_out, H)
    b1c = b1.reshape(H, 1).astype(jnp.float32)
    b2c = b2.reshape(H, 1).astype(jnp.float32)
    b3c = b3.reshape(C_out, 1).astype(jnp.float32)

    N_pad = _round_up(N, 128)
    if gather_in_kernel is None:
        # One-hot gather needs x^T resident plus two (N_pad, tile_e) bf16
        # temporaries; only take that path while it fits a 32 MiB VMEM budget.
        gather_in_kernel = (N_pad * tile_e <= (2 << 20)) and (C_in * N_pad * 2 <= (4 << 20))

    full = lambda shape: pl.BlockSpec(shape, lambda i: (0,) * len(shape))
    weight_specs = [full((H, C_in)), full((H, 1)),
                    full((H, H)), full((H, 1)),
                    full((C_out, H)), full((C_out, 1))]
    out_spec = pl.BlockSpec((C_out, tile_e), lambda i: (0, i))   # lane-dense store
    cparams = pltpu.CompilerParams(
        dimension_semantics=("parallel",),
        # Below v7x's 64 MiB physical VMEM; above v5e's 16 MiB scoped default.
        # (A deeper pl.Buffered(3) on the streamed spec is a v5e-only knob.)
        vmem_limit_bytes=32 * 1024 * 1024,
    )

    if gather_in_kernel:
        xt = jnp.pad(x.T.astype(jnp.bfloat16), ((0, 0), (0, N_pad - N)))   # (C_in, N_pad)
        out = pl.pallas_call(
            _linkpred_gather_kernel,
            out_shape=jax.ShapeDtypeStruct((C_out, E_pad), jnp.float32),
            grid_spec=pltpu.PrefetchScalarGridSpec(
                num_scalar_prefetch=0,
                grid=grid,
                in_specs=[pl.BlockSpec((2, tile_e), lambda i: (0, i)),  # edge ids
                          full((C_in, N_pad))] + weight_specs,         # resident x^T
                out_specs=out_spec,
            ),
            compiler_params=cparams,
        )(edges_pad, xt, w1t, b1c, w2t, b2c, w3t, b3c)
    else:
        # Big-graph fallback: gather + product in the wrapper, stream one
        # fully-packed (C_in, tile_e) bf16 block per step (half the HBM bytes
        # of streaming x_i and x_j separately).
        xc = x.astype(jnp.bfloat16)
        xi = xc[edges_pad[0]].astype(jnp.float32)
        xj = xc[edges_pad[1]].astype(jnp.float32)
        h0 = (xi * xj).T.astype(jnp.bfloat16)                          # (C_in, E_pad)
        out = pl.pallas_call(
            _linkpred_mlp_kernel,
            out_shape=jax.ShapeDtypeStruct((C_out, E_pad), jnp.float32),
            grid_spec=pltpu.PrefetchScalarGridSpec(
                num_scalar_prefetch=0,
                grid=grid,
                in_specs=[pl.BlockSpec((C_in, tile_e), lambda i: (0, i))] + weight_specs,
                out_specs=out_spec,
            ),
            compiler_params=cparams,
        )(h0, w1t, b1c, w2t, b2c, w3t, b3c)

    # (C_out, E_pad) -> (E, C_out); padded edges (node0, node0) are discarded.
    return out[:, :E].T


def init_params(key, in_channels, hidden_channels, out_channels):
    """torch.nn.Linear-style init: weight, bias ~ U(-1/sqrt(fan_in), 1/sqrt(fan_in)).
    Weights stored (fan_in, fan_out); biases 1-D."""
    ks = jax.random.split(key, 6)

    def lin(kw, kb, fan_in, fan_out):
        bound = 1.0 / math.sqrt(fan_in)
        w = jax.random.uniform(kw, (fan_in, fan_out), jnp.float32, -bound, bound)
        b = jax.random.uniform(kb, (fan_out,), jnp.float32, -bound, bound)
        return w, b

    w1, b1 = lin(ks[0], ks[1], in_channels, hidden_channels)
    w2, b2 = lin(ks[2], ks[3], hidden_channels, hidden_channels)
    w3, b3 = lin(ks[4], ks[5], hidden_channels, out_channels)
    return {"w1": w1, "b1": b1, "w2": w2, "b2": b2, "w3": w3, "b3": b3}


def reference_mlp(x_i, x_j, params):
    """Pure-JAX eval-mode MLP on already-gathered edge features (f32 math)."""
    h = x_i * x_j
    h = jnp.maximum(h @ params["w1"] + params["b1"], 0.0)
    h = jnp.maximum(h @ params["w2"] + params["b2"], 0.0)
    return jax.nn.sigmoid(h @ params["w3"] + params["b3"])


def reference_forward(x, edges, params):
    return reference_mlp(x[edges[0]], x[edges[1]], params)


if __name__ == "__main__":
    # Module config: in_channels=32, hidden_channels=32, out_channels=1,
    # num_layers=3, dropout=0.5 (identity at inference).
    in_channels, hidden_channels, out_channels = 32, 32, 1
    num_nodes, num_edges = 64, 1000            # E not a tile multiple on purpose

    key = jax.random.PRNGKey(0)
    k_x, k_e0, k_e1, k_p = jax.random.split(key, 4)

    x = jax.random.normal(k_x, (num_nodes, in_channels), jnp.float32)
    edges = jnp.stack([
        jax.random.randint(k_e0, (num_edges,), 0, num_nodes, dtype=jnp.int32),
        jax.random.randint(k_e1, (num_edges,), 0, num_nodes, dtype=jnp.int32),
    ], axis=0)                                 # [2, E]

    params = init_params(k_p, in_channels, hidden_channels, out_channels)

    # Path A: in-kernel one-hot gather (auto-selected for this small graph).
    out = link_predictor_forward(x, edges, params)
    out = jax.block_until_ready(out)
    assert out.shape == (num_edges, out_channels)

    # Path B: wrapper-gather fallback (exercises the streamed-product kernel).
    out_b = link_predictor_forward(x, edges, params, gather_in_kernel=False)
    out_b = jax.block_until_ready(out_b)
    assert out_b.shape == (num_edges, out_channels)

    # Reference with the same bf16 rounding of inputs/weights as the kernel.
    def _rb(a):
        return a.astype(jnp.bfloat16).astype(jnp.float32)
    params_b = dict(params)
    for k in ("w1", "w2", "w3"):
        params_b[k] = _rb(params[k])
    xb = _rb(x)
    ref_bf16 = reference_mlp(xb[edges[0]], xb[edges[1]], params_b)
    assert jnp.allclose(out, ref_bf16, atol=1e-2), "path A mismatch vs. bf16-rounded reference"
    assert jnp.allclose(out_b, ref_bf16, atol=1e-2), "path B mismatch vs. bf16-rounded reference"

    # Loose sanity check against the full-f32 module semantics.
    ref_f32 = reference_forward(x, edges, params)
    assert jnp.allclose(out, ref_f32, atol=5e-2), "mismatch vs. f32 reference"

    print("KERNEL_OK")
</pallas_src>

<mosaic_0001>
module attributes {stable_mosaic.version = 11 : i64} {
  func.func @_linkpred_gather_kernel(%arg0: i32, %arg1: memref<2x512xi32, #tpu.memory_space<vmem>>, %arg2: memref<32x128xbf16, #tpu.memory_space<vmem>>, %arg3: memref<32x32xbf16, #tpu.memory_space<vmem>>, %arg4: memref<32x1xf32, #tpu.memory_space<vmem>>, %arg5: memref<32x32xbf16, #tpu.memory_space<vmem>>, %arg6: memref<32x1xf32, #tpu.memory_space<vmem>>, %arg7: memref<1x32xbf16, #tpu.memory_space<vmem>>, %arg8: memref<1x1xf32, #tpu.memory_space<vmem>>, %arg9: memref<1x512xf32, #tpu.memory_space<vmem>>) attributes {dimension_semantics = [#tpu.dimension_semantics<parallel>], iteration_bounds = array<i64: 2>, scalar_prefetch = 0 : i64, scratch_operands = 0 : i64, tpu.core_type = #tpu.core_type<tc>, window_params = [{transform_indices = @transform_0, window_bounds = array<i64: 2, 512>}, {pipeline_mode = #tpu.pipeline_mode<synchronous>, transform_indices = @transform_1, window_bounds = array<i64: 32, 128>}, {pipeline_mode = #tpu.pipeline_mode<synchronous>, transform_indices = @transform_2, window_bounds = array<i64: 32, 32>}, {pipeline_mode = #tpu.pipeline_mode<synchronous>, transform_indices = @transform_3, window_bounds = array<i64: 32, 1>}, {pipeline_mode = #tpu.pipeline_mode<synchronous>, transform_indices = @transform_4, window_bounds = array<i64: 32, 32>}, {pipeline_mode = #tpu.pipeline_mode<synchronous>, transform_indices = @transform_5, window_bounds = array<i64: 32, 1>}, {pipeline_mode = #tpu.pipeline_mode<synchronous>, transform_indices = @transform_6, window_bounds = array<i64: 1, 32>}, {pipeline_mode = #tpu.pipeline_mode<synchronous>, transform_indices = @transform_7, window_bounds = array<i64: 1, 1>}, {transform_indices = @transform_8, window_bounds = array<i64: 1, 512>}]} {
    %0 = tpu.iota {dimensions = array<i32: 0>} : vector<128x512xi32>
    %c0 = arith.constant 0 : index
    %c0_0 = arith.constant 0 : index
    %1 = vector.load %arg1[%c0, %c0_0] : memref<2x512xi32, #tpu.memory_space<vmem>>, vector<1x512xi32>
    %2 = vector.broadcast %1 : vector<1x512xi32> to vector<128x512xi32>
    %3 = arith.cmpi eq, %0, %2 : vector<128x512xi32>
    %cst = arith.constant 1.000000e+00 : f32
    %cst_1 = arith.constant 0.000000e+00 : f32
    %4 = vector.broadcast %cst : f32 to vector<128x512xf32>
    %5 = vector.broadcast %cst_1 : f32 to vector<128x512xf32>
    %6 = arith.select %3, %4, %5 : vector<128x512xi1>, vector<128x512xf32>
    %7 = arith.truncf %6 : vector<128x512xf32> to vector<128x512xbf16>
    %c1 = arith.constant 1 : index
    %c0_2 = arith.constant 0 : index
    %8 = vector.load %arg1[%c1, %c0_2] : memref<2x512xi32, #tpu.memory_space<vmem>>, vector<1x512xi32>
    %9 = vector.broadcast %8 : vector<1x512xi32> to vector<128x512xi32>
    %10 = arith.cmpi eq, %0, %9 : vector<128x512xi32>
    %cst_3 = arith.constant 1.000000e+00 : f32
    %cst_4 = arith.constant 0.000000e+00 : f32
    %11 = vector.broadcast %cst_3 : f32 to vector<128x512xf32>
    %12 = vector.broadcast %cst_4 : f32 to vector<128x512xf32>
    %13 = arith.select %10, %11, %12 : vector<128x512xi1>, vector<128x512xf32>
    %14 = arith.truncf %13 : vector<128x512xf32> to vector<128x512xbf16>
    %c0_5 = arith.constant 0 : index
    %c0_6 = arith.constant 0 : index
    %15 = vector.load %arg2[%c0_5, %c0_6] : memref<32x128xbf16, #tpu.memory_space<vmem>>, vector<32x128xbf16>
    %cst_7 = arith.constant dense<0.000000e+00> : vector<32x512xf32>
    %16 = tpu.matmul %15, %7, %cst_7 {dimension_numbers = #tpu.dot_dimension_numbers<[1], [0], [0], [1], [0, 0, 1, 1], [], []>} : vector<32x128xbf16>, vector<128x512xbf16>, vector<32x512xf32> -> vector<32x512xf32>
    %cst_8 = arith.constant dense<0.000000e+00> : vector<32x512xf32>
    %17 = tpu.matmul %15, %14, %cst_8 {dimension_numbers = #tpu.dot_dimension_numbers<[1], [0], [0], [1], [0, 0, 1, 1], [], []>} : vector<32x128xbf16>, vector<128x512xbf16>, vector<32x512xf32> -> vector<32x512xf32>
    %18 = arith.mulf %16, %17 : vector<32x512xf32>
    %19 = arith.truncf %18 : vector<32x512xf32> to vector<32x512xbf16>
    %c0_9 = arith.constant 0 : index
    %c0_10 = arith.constant 0 : index
    %20 = vector.load %arg3[%c0_9, %c0_10] : memref<32x32xbf16, #tpu.memory_space<vmem>>, vector<32x32xbf16>
    %cst_11 = arith.constant dense<0.000000e+00> : vector<32x512xf32>
    %21 = tpu.matmul %20, %19, %cst_11 {dimension_numbers = #tpu.dot_dimension_numbers<[1], [0], [0], [1], [0, 0, 1, 1], [], []>} : vector<32x32xbf16>, vector<32x512xbf16>, vector<32x512xf32> -> vector<32x512xf32>
    %c0_12 = arith.constant 0 : index
    %c0_13 = arith.constant 0 : index
    %22 = vector.load %arg4[%c0_12, %c0_13] : memref<32x1xf32, #tpu.memory_space<vmem>>, vector<32x1xf32>
    %23 = vector.broadcast %22 : vector<32x1xf32> to vector<32x512xf32>
    %24 = arith.addf %21, %23 : vector<32x512xf32>
    %cst_14 = arith.constant 0.000000e+00 : f32
    %25 = vector.broadcast %cst_14 : f32 to vector<32x512xf32>
    %26 = arith.maximumf %24, %25 : vector<32x512xf32>
    %27 = arith.truncf %26 : vector<32x512xf32> to vector<32x512xbf16>
    %c0_15 = arith.constant 0 : index
    %c0_16 = arith.constant 0 : index
    %28 = vector.load %arg5[%c0_15, %c0_16] : memref<32x32xbf16, #tpu.memory_space<vmem>>, vector<32x32xbf16>
    %cst_17 = arith.constant dense<0.000000e+00> : vector<32x512xf32>
    %29 = tpu.matmul %28, %27, %cst_17 {dimension_numbers = #tpu.dot_dimension_numbers<[1], [0], [0], [1], [0, 0, 1, 1], [], []>} : vector<32x32xbf16>, vector<32x512xbf16>, vector<32x512xf32> -> vector<32x512xf32>
    %c0_18 = arith.constant 0 : index
    %c0_19 = arith.constant 0 : index
    %30 = vector.load %arg6[%c0_18, %c0_19] : memref<32x1xf32, #tpu.memory_space<vmem>>, vector<32x1xf32>
    %31 = vector.broadcast %30 : vector<32x1xf32> to vector<32x512xf32>
    %32 = arith.addf %29, %31 : vector<32x512xf32>
    %cst_20 = arith.constant 0.000000e+00 : f32
    %33 = vector.broadcast %cst_20 : f32 to vector<32x512xf32>
    %34 = arith.maximumf %32, %33 : vector<32x512xf32>
    %35 = arith.truncf %34 : vector<32x512xf32> to vector<32x512xbf16>
    %c0_21 = arith.constant 0 : index
    %c0_22 = arith.constant 0 : index
    %36 = vector.load %arg7[%c0_21, %c0_22] : memref<1x32xbf16, #tpu.memory_space<vmem>>, vector<1x32xbf16>
    %cst_23 = arith.constant dense<0.000000e+00> : vector<1x512xf32>
    %37 = tpu.matmul %36, %35, %cst_23 {dimension_numbers = #tpu.dot_dimension_numbers<[1], [0], [0], [1], [0, 0, 1, 1], [], []>} : vector<1x32xbf16>, vector<32x512xbf16>, vector<1x512xf32> -> vector<1x512xf32>
    %c0_24 = arith.constant 0 : index
    %c0_25 = arith.constant 0 : index
    %38 = vector.load %arg8[%c0_24, %c0_25] : memref<1x1xf32, #tpu.memory_space<vmem>>, vector<1x1xf32>
    %39 = vector.broadcast %38 : vector<1x1xf32> to vector<1x512xf32>
    %40 = arith.addf %37, %39 : vector<1x512xf32>
    %41 = arith.negf %40 : vector<1x512xf32>
    %42 = math.exp %41 : vector<1x512xf32>
    %cst_26 = arith.constant 1.000000e+00 : f32
    %43 = vector.broadcast %cst_26 : f32 to vector<1x512xf32>
    %44 = arith.addf %43, %42 : vector<1x512xf32>
    %45 = arith.divf %43, %44 : vector<1x512xf32>
    %c0_27 = arith.constant 0 : index
    %c0_28 = arith.constant 0 : index
    %46 = vector.load %arg9[%c0_27, %c0_28] : memref<1x512xf32, #tpu.memory_space<vmem>>, vector<1x512xf32>
    tpu.vector_store %arg9[%c0_27, %c0_28], %45 {strides = array<i32>} : memref<1x512xf32, #tpu.memory_space<vmem>>, vector<1x512xf32>,
    return
  }
  func.func @transform_0(%arg0: i32) -> (i32, i32) {
    %c0_i32 = arith.constant 0 : i32
    %c0_i32_0 = arith.constant 0 : i32
    return %c0_i32, %arg0 : i32, i32
  }
  func.func @transform_1(%arg0: i32) -> (i32, i32) {
    %c0_i32 = arith.constant 0 : i32
    %c0_i32_0 = arith.constant 0 : i32
    %c0_i32_1 = arith.constant 0 : i32
    return %c0_i32, %c0_i32_0 : i32, i32
  }
  func.func @transform_2(%arg0: i32) -> (i32, i32) {
    %c0_i32 = arith.constant 0 : i32
    %c0_i32_0 = arith.constant 0 : i32
    %c0_i32_1 = arith.constant 0 : i32
    return %c0_i32, %c0_i32_0 : i32, i32
  }
  func.func @transform_3(%arg0: i32) -> (i32, i32) {
    %c0_i32 = arith.constant 0 : i32
    %c0_i32_0 = arith.constant 0 : i32
    %c0_i32_1 = arith.constant 0 : i32
    return %c0_i32, %c0_i32_0 : i32, i32
  }
  func.func @transform_4(%arg0: i32) -> (i32, i32) {
    %c0_i32 = arith.constant 0 : i32
    %c0_i32_0 = arith.constant 0 : i32
    %c0_i32_1 = arith.constant 0 : i32
    return %c0_i32, %c0_i32_0 : i32, i32
  }
  func.func @transform_5(%arg0: i32) -> (i32, i32) {
    %c0_i32 = arith.constant 0 : i32
    %c0_i32_0 = arith.constant 0 : i32
    %c0_i32_1 = arith.constant 0 : i32
    return %c0_i32, %c0_i32_0 : i32, i32
  }
  func.func @transform_6(%arg0: i32) -> (i32, i32) {
    %c0_i32 = arith.constant 0 : i32
    %c0_i32_0 = arith.constant 0 : i32
    %c0_i32_1 = arith.constant 0 : i32
    return %c0_i32, %c0_i32_0 : i32, i32
  }
  func.func @transform_7(%arg0: i32) -> (i32, i32) {
    %c0_i32 = arith.constant 0 : i32
    %c0_i32_0 = arith.constant 0 : i32
    %c0_i32_1 = arith.constant 0 : i32
    return %c0_i32, %c0_i32_0 : i32, i32
  }
  func.func @transform_8(%arg0: i32) -> (i32, i32) {
    %c0_i32 = arith.constant 0 : i32
    %c0_i32_0 = arith.constant 0 : i32
    return %c0_i32, %arg0 : i32, i32
  }
}

</mosaic_0001>

<bundles_post_ra>
// kernel: tpu_custom_call.1
= control target key start
LH: loop header
LB: loop body
LE: loop exit
PB: predicated region body
PF: predicated region fallthrough
CT: control target
= control target key end

     0   :  { %s2452_s0 = inlined_call_operand.vmem [shape: s32[2,1024], index: 0, kind: input, shape index: {}]   ;;  %s2453_s1 = inlined_call_operand.vmem [shape: bf16[32,128], index: 1, kind: input, shape index: {}]   ;;  %s2454_s2 = inlined_call_operand.vmem [shape: bf16[32,32], index: 2, kind: input, shape index: {}]   ;;  %s2455_s3 = inlined_call_operand.vmem [shape: f32[32,1], index: 3, kind: input, shape index: {}]   ;;  %s2456_s4 = inlined_call_operand.vmem [shape: bf16[32,32], index: 4, kind: input, shape index: {}]   ;;  %s2457_s5 = inlined_call_operand.vmem [shape: f32[32,1], index: 5, kind: input, shape index: {}]   ;;  %s2458_s6 = inlined_call_operand.vmem [shape: bf16[1,32], index: 6, kind: input, shape index: {}]   ;;  %s2459_s7 = inlined_call_operand.<no memory space> [shape: f32[1,1], index: 7, kind: input, shape index: {}]   ;;  %s2460_s8 = inlined_call_operand.hbm [shape: f32[1,1024], index: 8, kind: output, shape index: {}]  }
   0x1   :  { %v13_v0 = vstv %s2459_s7 }
   0x2   :  { %14 = vst [vmem:[#allocation2] sm:$0x1] %v13_v0 }
   0x3   :  { %15 = vsyncpa [#allocation4], 0 }
   0x4   :  { %17 = vsyncpa [#allocation4 + $0x1], 0  ;;  %s1855_s29 = smov 0   ;;  %s1857_s30 = smov 0  }
   0x5   :  { %s1859_s9 = smov 0   ;;  %s1861_s10 = smov 0  }
   0x6 LB: > { %s1876_s7 = sadd.s32 4294967295, %s1801_s10   ;;  %s1511_s11 = sadd.s32 4294967294, %s1801_s10   ;;  %s1801_s10 = sphi %s1861_s10, %s2466_s10   ;;  %s1797_s9 = sphi %s1859_s9, %s2465_s9   ;;  %s1793_s30 = sphi %s1857_s30, %s2464_s30   ;;  %s1789_s29 = sphi %s1855_s29, %s2463_s29  }
   0x7   : > { %s1880_s12 = sadd.s32 1, %s1801_s10   ;;  %s203_s13 = sadd.s32 1, %s1797_s9 }
   0x8   : > { %s200_s14 = ssub.s32 %s1801_s10, %s1880_s12  ;;  %p213_p0 = scmp.ne.s32.totalorder %s1797_s9, %s1793_s30 }
   0x9   : > { %p201_p1 = scmp.eq.s32.totalorder %s200_s14, 0  ;;  %p214_p2 = scmp.eq.s32.totalorder %s1876_s7, 1 }
   0xa   : > { %p219_p3 = scmp.ne.s32.totalorder %s1793_s30, %s1789_s29  ;;  %p220_p4 = scmp.eq.s32.totalorder %s1511_s11, 1 }
   0xb   : > { %s1891_s15 = scalar_select %p201_p1, %s1797_s9, %s203_s13  }
   0xc   : > { %p1893_p5 = por %p214_p2, %p213_p0  ;;  %p1897_p6 = por %p220_p4, %p219_p3 }
   0xd   : > { %p1514_p7 = scmp.ge.s32.totalorder %s1801_s10, 1  ;;  %p268_p8 = scmp.lt.s32.totalorder %s1801_s10, 3 }
   0xf   : > { %p269_p9 = pnand %p1514_p7, %p268_p8 }
  0x10   : > { %s1516_s18 = sshll.u32 (!%p269_p9), %s1876_s7, 2  ;;  %v310_v1 = vlaneseq (!%p269_p9)  ;;  %v1803_v2 = vmov (!%p269_p9), 0   ;;  %v1804_v16 = vmov (!%p269_p9), 1.0|1.0   ;;  %v2164_v34 = vld [vmem:[%s2453_s1] sm:$0xff] (!%p269_p9)   ;;  %v2217_v35 = vld [vmem:[%s2453_s1 + $0x8] sm:$0xff] (!%p269_p9)  }
  0x11   : > { %272 = sbr.rel (%p269_p9) target bundleno = 1059 (0x423), region = 52  ;;  %p303_p10 = scmp.lt.s32.totalorder (!%p269_p9), %s1516_s18, 7  ;;  %730 = vmatprep.mubr.bf16.mxu0 (!%p269_p9), %v1803_v2  ;;  %783 = vmatprep.mubr.bf16.mxu1 (!%p269_p9), %v1803_v2  ;;  %v938_v36 = vld [vmem:[%s2455_s3] sm:$0xff] (!%p269_p9)  ;;  %v940_v37 = vld [vmem:[%s2455_s3 + $0x10] sm:$0xff] (!%p269_p9)  ;;  %v939_v38 = vld [vmem:[%s2455_s3 + $0x8] sm:$0xff] (!%p269_p9) }
  0x12   : > { %v1907_v3 = vshrl.u32 (!%p269_p9), %v310_v1, 7  ;;  %1715 = vset.pattern.permute.xlu0 (!%p269_p9), %v1803_v2  ;;  %1716 = vset.pattern.permute.xlu1 (!%p269_p9), %v1803_v2  ;;  %v941_v39 = vld [vmem:[%s2455_s3 + $0x18] sm:$0xff] (!%p269_p9)  ;;  %v1113_v40 = vld [vmem:[%s2457_s5] sm:$0xff] (!%p269_p9)  ;;  %v1114_v41 = vld [vmem:[%s2457_s5 + $0x8] sm:$0xff] (!%p269_p9)  ;;  %s299_s25 = sand.u32 (!%p269_p9), 1, %s1793_s30   ;;  %s1672_s27 = sshll.u32 (!%p269_p9), %s1876_s7, 6 }
  0x13   : > { %944 = vperm.xlu0 (!%p269_p9), %1715, %v938_v36   ;;  %954 = vperm.xlu1 (!%p269_p9), %1716, %v940_v37   ;;  %v1115_v42 = vld [vmem:[%s2457_s5 + $0x10] sm:$0xff] (!%p269_p9)  ;;  %v1116_v43 = vld [vmem:[%s2457_s5 + $0x18] sm:$0xff] (!%p269_p9)  ;;  %v1284_v44 = vld [vmem:[#allocation2] sm:$0x1] (!%p269_p9)  ;;  %s1515_s26 = sshll.u32 (!%p269_p9), %s299_s25, 2  ;;  %s1806_s7 = smov (!%p269_p9), [#allocation3]  }
  0x14   : > { %v334_v4 = vsub.s32 (!%p269_p9), 1, %v1907_v3  ;;  %v342_v5 = vsub.s32 (!%p269_p9), 3, %v1907_v3  ;;  %v1914_v6 = vsub.s32 (!%p269_p9), 0, %v1907_v3  ;;  %v338_v7 = vsub.s32 (!%p269_p9), 2, %v1907_v3  ;;  %s301_s28 = scalar_lea.vmem (!%p269_p9), [#allocation3], %s1515_s26  ;;  %s1743_s21 = sshll.u32 (!%p269_p9), %s1806_s7, 4  ;;  %s1744_s21 = int_to_ptr.vmem [resolvable:$false] %s1743_s21 }
  0x15   : > { %v1923_v8 = vadd.s32 (!%p269_p9), 8, %v1907_v3  ;;  %v1927_v10 = vadd.s32 (!%p269_p9), 16, %v1907_v3  ;;  %v1930_v11 = vadd.s32 (!%p269_p9), 24, %v1907_v3  ;;  %v1969_v17 = vadd.s32 (!%p269_p9), 32, %v1907_v3  ;;  %s1452_s11 = sshll.u32 (!%p269_p9), %s301_s28, 4  ;;  %s2412_s11 = int_to_ptr.vmem [resolvable:$true] %s1452_s11 }
  0x16   : > { %v1972_v18 = vadd.s32 (!%p269_p9), 40, %v1907_v3  ;;  %v1995_v19 = vadd.s32 (!%p269_p9), 48, %v1907_v3  ;;  %v1998_v20 = vadd.s32 (!%p269_p9), 56, %v1907_v3  ;;  %v2021_v21 = vadd.s32 (!%p269_p9), 64, %v1907_v3  ;;  %s1739_s20 = scalar_lea.vmem (!%p269_p9), %s2412_s11, 64  ;;  %p1746_p0 = scmp.lt.s32.totalorder (!%p269_p9), %s2412_s11, %s1744_s21 }
  0x17   : > { %v2024_v22 = vadd.s32 (!%p269_p9), 72, %v1907_v3  ;;  %v2047_v23 = vadd.s32 (!%p269_p9), 80, %v1907_v3  ;;  %v2050_v24 = vadd.s32 (!%p269_p9), 88, %v1907_v3  ;;  %v2073_v25 = vadd.s32 (!%p269_p9), 96, %v1907_v3  ;;  %949 = vperm.xlu0 (!%p269_p9), %1715, %v939_v38   ;;  %959 = vperm.xlu1 (!%p269_p9), %1716, %v941_v39   ;;  %p1740_p11 = scmp.ne.s32.totalorder (!%p269_p9), %s2412_s11, %s1739_s20 }
  0x18   : > { %s2468_s18 = smov (!%p303_p10, %s1516_s18), 7  ;;  %v2076_v26 = vadd.s32 104, %v1907_v3  ;;  %v2099_v27 = vadd.s32 112, %v1907_v3  ;;  %v2102_v28 = vadd.s32 120, %v1907_v3 }
  0x19   : > { %s1517_s19 = sshll.u32 %s2468_s18, 1  ;;  %s2410_s18 = scalar_lea.hbm %s2460_s8, %s1672_s27 }
  0x1a   : > { %s1920_s22 = scalar_lea.vmem %s2452_s0, %s1517_s19  ;;  %s1438_s19 = scalar_lea.sflag [#allocation4], %s299_s25 }
  0x1b   : > { %v327_v9 = vld [vmem:[%s1920_s22] ss:$2 sm:$0xf]  ;;  %v1518_v29 = vld [vmem:[%s1920_s22 + $0x1] ss:$2 sm:$0xf]  ;;  %1119 = vperm.xlu0 %1715, %v1113_v40   ;;  %1124 = vperm.xlu1 %1716, %v1114_v41   ;;  %p1741_p12 = pnand %p1740_p11, %p1893_p5 }
  0x1c   : > { %v1934_v12 = vrot.slane %v327_v9, %v334_v4  ;;  %v1938_v13 = vrot.slane %v327_v9, %v342_v5  ;;  %v1941_v14 = vrot.slane %v327_v9, %v1914_v6  ;;  %v1945_v15 = vrot.slane %v327_v9, %v338_v7  ;;  %v1719_v41 = vld [vmem:[%s2454_s2] sm:$0xff]   ;;  %s1745_s22 = scalar_lea.vmem %s1744_s21, 128 }
  0x1d   : > { %v2127_v30 = vrot.slane %v1518_v29, %v334_v4  ;;  %v2136_v31 = vrot.slane %v1518_v29, %v342_v5  ;;  %v2144_v32 = vrot.slane %v1518_v29, %v1914_v6  ;;  %v2153_v33 = vrot.slane %v1518_v29, %v338_v7  ;;  %p1742_p13 = pneg %p1741_p12  ;;  %p1747_p1 = scmp.lt.s32.totalorder %s1745_s22, %s1739_s20 }
  0x1e   : > { %vm345_vm0 = vcmp.eq.s32.totalorder %v1907_v3, %v1934_v12  ;;  %vm349_vm1 = vcmp.eq.s32.totalorder %v1923_v8, %v1934_v12  ;;  %vm347_vm2 = vcmp.eq.s32.totalorder %v1907_v3, %v1938_v13  ;;  %vm351_vm3 = vcmp.eq.s32.totalorder %v1923_v8, %v1938_v13 }
  0x1f   : > { %vm1521_vm4 = vmpackc.low %vm349_vm1, %vm345_vm0  ;;  %vm344_vm5 = vcmp.eq.s32.totalorder %v1907_v3, %v1941_v14  ;;  %vm348_vm6 = vcmp.eq.s32.totalorder %v1923_v8, %v1941_v14  ;;  %vm346_vm7 = vcmp.eq.s32.totalorder %v1907_v3, %v1945_v15  ;;  %vm350_vm8 = vcmp.eq.s32.totalorder %v1923_v8, %v1945_v15  ;;  %1129 = vperm.xlu0 %1715, %v1115_v42   ;;  %v1720_v42 = vld [vmem:[%s2454_s2 + $0x8] sm:$0xff]   ;;  %p1748_p2 = por %p1747_p1, %p1746_p0 }
  0x20   : > { %1522 = vmatprep.subr.msk.bf16.mxu0 %vm1521_vm4, %v1804_v16  ;;  %vm1553_vm9 = vmpackc.low %vm351_vm3, %vm347_vm2  ;;  %vm353_vm10 = vcmp.eq.s32.totalorder %v1927_v10, %v1934_v12  ;;  %vm357_vm11 = vcmp.eq.s32.totalorder %v1930_v11, %v1934_v12  ;;  %vm355_vm13 = vcmp.eq.s32.totalorder %v1927_v10, %v1938_v13  ;;  %vm359_vm14 = vcmp.eq.s32.totalorder %v1930_v11, %v1938_v13 }
  0x21   : > { %1554 = vmatprep.subr.msk.bf16.mxu1 %vm1553_vm9, %v1804_v16  ;;  %vm1523_vm12 = vmpackc.low %vm348_vm6, %vm344_vm5  ;;  %vm352_vm0 = vcmp.eq.s32.totalorder %v1927_v10, %v1941_v14  ;;  %vm356_vm1 = vcmp.eq.s32.totalorder %v1930_v11, %v1941_v14  ;;  %vm354_vm3 = vcmp.eq.s32.totalorder %v1927_v10, %v1945_v15  ;;  %vm358_vm4 = vcmp.eq.s32.totalorder %v1930_v11, %v1945_v15  ;;  %p1749_p3 = pnand %p1748_p2, %p1742_p13 }
  0x22   : > { %1524 = vmatpush1.bf16.msk.msra.mxu0 %vm1523_vm12, %v1804_v16  ;;  %vm1555_vm15 = vmpackc.low %vm350_vm8, %vm346_vm7  ;;  %vm361_vm6 = vcmp.eq.s32.totalorder %v1969_v17, %v1934_v12  ;;  %vm365_vm7 = vcmp.eq.s32.totalorder %v1972_v18, %v1934_v12  ;;  %vm363_vm9 = vcmp.eq.s32.totalorder %v1969_v17, %v1938_v13  ;;  %vm360_vm12 = vcmp.eq.s32.totalorder %v1969_v17, %v1941_v14 }
  0x23   : > { %1556 = vmatpush1.bf16.msk.msra.mxu1 %vm1555_vm15, %v1804_v16  ;;  %vm1525_vm2 = vmpackc.low %vm357_vm11, %vm353_vm10  ;;  %vm367_vm10 = vcmp.eq.s32.totalorder %v1972_v18, %v1938_v13  ;;  %vm362_vm15 = vcmp.eq.s32.totalorder %v1969_v17, %v1945_v15  ;;  %1134 = vperm.xlu1 %1716, %v1116_v43  }
  0x24   : > { %1526 = vmatprep.subr.msk.bf16.mxu0 %vm1525_vm2, %v1804_v16  ;;  %vm1557_vm5 = vmpackc.low %vm359_vm14, %vm355_vm13  ;;  %vm364_vm13 = vcmp.eq.s32.totalorder %v1972_v18, %v1941_v14  ;;  %vm369_vm2 = vcmp.eq.s32.totalorder %v1995_v19, %v1934_v12  ;;  %1287 = vperm.xlu0 %1715, %v1284_v44  }
  0x25   : > { %1558 = vmatprep.subr.msk.bf16.mxu1 %vm1557_vm5, %v1804_v16  ;;  %vm1527_vm8 = vmpackc.low %vm356_vm1, %vm352_vm0  ;;  %vm366_vm0 = vcmp.eq.s32.totalorder %v1972_v18, %v1945_v15  ;;  %vm371_vm5 = vcmp.eq.s32.totalorder %v1995_v19, %v1938_v13 }
  0x26   : > { %1528 = vmatpush1.bf16.msk.msra.mxu0 %vm1527_vm8, %v1804_v16  ;;  %vm1559_vm11 = vmpackc.low %vm358_vm4, %vm354_vm3  ;;  %vm373_vm3 = vcmp.eq.s32.totalorder %v1998_v20, %v1934_v12  ;;  %vm368_vm8 = vcmp.eq.s32.totalorder %v1995_v19, %v1941_v14 }
  0x27   : > { %1560 = vmatpush1.bf16.msk.msra.mxu1 %vm1559_vm11, %v1804_v16  ;;  %vm1529_vm14 = vmpackc.low %vm365_vm7, %vm361_vm6  ;;  %vm375_vm6 = vcmp.eq.s32.totalorder %v1998_v20, %v1938_v13  ;;  %vm370_vm11 = vcmp.eq.s32.totalorder %v1995_v19, %v1945_v15 }
  0x28   : > { %1530 = vmatprep.subr.msk.bf16.mxu0 %vm1529_vm14, %v1804_v16  ;;  %vm1561_vm1 = vmpackc.low %vm367_vm10, %vm363_vm9  ;;  %vm372_vm9 = vcmp.eq.s32.totalorder %v1998_v20, %v1941_v14  ;;  %vm377_vm14 = vcmp.eq.s32.totalorder %v2021_v21, %v1934_v12 }
  0x29   : > { %1562 = vmatprep.subr.msk.bf16.mxu1 %vm1561_vm1, %v1804_v16  ;;  %vm1531_vm4 = vmpackc.low %vm364_vm13, %vm360_vm12  ;;  %vm374_vm12 = vcmp.eq.s32.totalorder %v1998_v20, %v1945_v15  ;;  %vm379_vm1 = vcmp.eq.s32.totalorder %v2021_v21, %v1938_v13 }
  0x2a   : > { %1532 = vmatpush1.bf16.msk.msra.mxu0 %vm1531_vm4, %v1804_v16  ;;  %vm1563_vm7 = vmpackc.low %vm366_vm0, %vm362_vm15  ;;  %vm381_vm15 = vcmp.eq.s32.totalorder %v2024_v22, %v1934_v12  ;;  %vm376_vm4 = vcmp.eq.s32.totalorder %v2021_v21, %v1941_v14 }
  0x2b   : > { %1564 = vmatpush1.bf16.msk.msra.mxu1 %vm1563_vm7, %v1804_v16  ;;  %vm1533_vm10 = vmpackc.low %vm373_vm3, %vm369_vm2  ;;  %vm383_vm2 = vcmp.eq.s32.totalorder %v2024_v22, %v1938_v13  ;;  %vm378_vm7 = vcmp.eq.s32.totalorder %v2021_v21, %v1945_v15 }
  0x2c   : > { %1534 = vmatprep.subr.msk.bf16.mxu0 %vm1533_vm10, %v1804_v16  ;;  %vm1565_vm13 = vmpackc.low %vm375_vm6, %vm371_vm5  ;;  %vm380_vm5 = vcmp.eq.s32.totalorder %v2024_v22, %v1941_v14  ;;  %vm385_vm10 = vcmp.eq.s32.totalorder %v2047_v23, %v1934_v12 }
  0x2d   : > { %1566 = vmatprep.subr.msk.bf16.mxu1 %vm1565_vm13, %v1804_v16  ;;  %vm1535_vm0 = vmpackc.low %vm372_vm9, %vm368_vm8  ;;  %vm382_vm8 = vcmp.eq.s32.totalorder %v2024_v22, %v1945_v15  ;;  %vm387_vm13 = vcmp.eq.s32.totalorder %v2047_v23, %v1938_v13 }
  0x2e   : > { %1536 = vmatpush1.bf16.msk.msra.mxu0 %vm1535_vm0, %v1804_v16  ;;  %vm1567_vm3 = vmpackc.low %vm374_vm12, %vm370_vm11  ;;  %vm389_vm11 = vcmp.eq.s32.totalorder %v2050_v24, %v1934_v12  ;;  %vm384_vm0 = vcmp.eq.s32.totalorder %v2047_v23, %v1941_v14 }
  0x2f   : > { %1568 = vmatpush1.bf16.msk.msra.mxu1 %vm1567_vm3, %v1804_v16  ;;  %vm1537_vm6 = vmpackc.low %vm381_vm15, %vm377_vm14  ;;  %vm391_vm14 = vcmp.eq.s32.totalorder %v2050_v24, %v1938_v13  ;;  %vm386_vm3 = vcmp.eq.s32.totalorder %v2047_v23, %v1945_v15 }
  0x30   : > { %1538 = vmatprep.subr.msk.bf16.mxu0 %vm1537_vm6, %v1804_v16  ;;  %vm1569_vm9 = vmpackc.low %vm383_vm2, %vm379_vm1  ;;  %vm388_vm1 = vcmp.eq.s32.totalorder %v2050_v24, %v1941_v14  ;;  %vm393_vm6 = vcmp.eq.s32.totalorder %v2073_v25, %v1934_v12 }
  0x31   : > { %1570 = vmatprep.subr.msk.bf16.mxu1 %vm1569_vm9, %v1804_v16  ;;  %vm1539_vm12 = vmpackc.low %vm380_vm5, %vm376_vm4  ;;  %vm390_vm4 = vcmp.eq.s32.totalorder %v2050_v24, %v1945_v15  ;;  %vm395_vm9 = vcmp.eq.s32.totalorder %v2073_v25, %v1938_v13 }
  0x32   : > { %1540 = vmatpush1.bf16.msk.msra.mxu0 %vm1539_vm12, %v1804_v16  ;;  %vm1571_vm15 = vmpackc.low %vm382_vm8, %vm378_vm7  ;;  %vm397_vm7 = vcmp.eq.s32.totalorder %v2076_v26, %v1934_v12  ;;  %vm392_vm12 = vcmp.eq.s32.totalorder %v2073_v25, %v1941_v14 }
  0x33   : > { %1572 = vmatpush1.bf16.msk.msra.mxu1 %vm1571_vm15, %v1804_v16  ;;  %vm1541_vm2 = vmpackc.low %vm389_vm11, %vm385_vm10  ;;  %vm399_vm10 = vcmp.eq.s32.totalorder %v2076_v26, %v1938_v13  ;;  %vm394_vm15 = vcmp.eq.s32.totalorder %v2073_v25, %v1945_v15 }
  0x34   : > { %1542 = vmatprep.subr.msk.bf16.mxu0 %vm1541_vm2, %v1804_v16  ;;  %vm1573_vm5 = vmpackc.low %vm391_vm14, %vm387_vm13  ;;  %vm396_vm13 = vcmp.eq.s32.totalorder %v2076_v26, %v1941_v14  ;;  %vm401_vm2 = vcmp.eq.s32.totalorder %v2099_v27, %v1934_v12 }
  0x35   : > { %1574 = vmatprep.subr.msk.bf16.mxu1 %vm1573_vm5, %v1804_v16  ;;  %vm1543_vm8 = vmpackc.low %vm388_vm1, %vm384_vm0  ;;  %vm398_vm0 = vcmp.eq.s32.totalorder %v2076_v26, %v1945_v15  ;;  %vm403_vm5 = vcmp.eq.s32.totalorder %v2099_v27, %v1938_v13 }
  0x36   : > { %1544 = vmatpush1.bf16.msk.msra.mxu0 %vm1543_vm8, %v1804_v16  ;;  %vm1575_vm11 = vmpackc.low %vm390_vm4, %vm386_vm3  ;;  %vm405_vm3 = vcmp.eq.s32.totalorder %v2102_v28, %v1934_v12  ;;  %vm400_vm8 = vcmp.eq.s32.totalorder %v2099_v27, %v1941_v14 }
  0x37   : > { %1576 = vmatpush1.bf16.msk.msra.mxu1 %vm1575_vm11, %v1804_v16  ;;  %vm1545_vm14 = vmpackc.low %vm397_vm7, %vm393_vm6  ;;  %vm407_vm6 = vcmp.eq.s32.totalorder %v2102_v28, %v1938_v13  ;;  %vm402_vm11 = vcmp.eq.s32.totalorder %v2099_v27, %v1945_v15 }
  0x38   : > { %1546 = vmatprep.subr.msk.bf16.mxu0 %vm1545_vm14, %v1804_v16  ;;  %vm1577_vm1 = vmpackc.low %vm399_vm10, %vm395_vm9  ;;  %vm404_vm9 = vcmp.eq.s32.totalorder %v2102_v28, %v1941_v14  ;;  %vm523_vm14 = vcmp.eq.s32.totalorder %v1907_v3, %v2127_v30 }
  0x39   : > { %1578 = vmatprep.subr.msk.bf16.mxu1 %vm1577_vm1, %v1804_v16  ;;  %vm1547_vm4 = vmpackc.low %vm396_vm13, %vm392_vm12  ;;  %vm406_vm12 = vcmp.eq.s32.totalorder %v2102_v28, %v1945_v15  ;;  %vm525_vm1 = vcmp.eq.s32.totalorder %v1907_v3, %v2136_v31 }
  0x3a   : > { %1548 = vmatpush1.bf16.msk.msra.mxu0 %vm1547_vm4, %v1804_v16  ;;  %vm1579_vm7 = vmpackc.low %vm398_vm0, %vm394_vm15  ;;  %vm527_vm15 = vcmp.eq.s32.totalorder %v1923_v8, %v2127_v30  ;;  %vm522_vm4 = vcmp.eq.s32.totalorder %v1907_v3, %v2144_v32 }
  0x3b   : > { %1580 = vmatpush1.bf16.msk.msra.mxu1 %vm1579_vm7, %v1804_v16  ;;  %vm1549_vm10 = vmpackc.low %vm405_vm3, %vm401_vm2  ;;  %vm529_vm2 = vcmp.eq.s32.totalorder %v1923_v8, %v2136_v31  ;;  %vm524_vm7 = vcmp.eq.s32.totalorder %v1907_v3, %v2153_v33 }
  0x3c   : > { %1550 = vmatprep.subr.msk.bf16.mxu0 %vm1549_vm10, %v1804_v16  ;;  %vm1581_vm13 = vmpackc.low %vm407_vm6, %vm403_vm5  ;;  %vm526_vm5 = vcmp.eq.s32.totalorder %v1923_v8, %v2144_v32  ;;  %vm531_vm10 = vcmp.eq.s32.totalorder %v1927_v10, %v2127_v30 }
  0x3d   : > { %1582 = vmatprep.subr.msk.bf16.mxu1 %vm1581_vm13, %v1804_v16  ;;  %vm1551_vm0 = vmpackc.low %vm404_vm9, %vm400_vm8  ;;  %vm528_vm8 = vcmp.eq.s32.totalorder %v1923_v8, %v2153_v33  ;;  %vm533_vm13 = vcmp.eq.s32.totalorder %v1927_v10, %v2136_v31 }
  0x3e   : > { %1552 = vmatpush1.bf16.msk.msra.mxu0 %vm1551_vm0, %v1804_v16  ;;  %vm1583_vm3 = vmpackc.low %vm406_vm12, %vm402_vm11  ;;  %vm535_vm11 = vcmp.eq.s32.totalorder %v1930_v11, %v2127_v30  ;;  %vm530_vm0 = vcmp.eq.s32.totalorder %v1927_v10, %v2144_v32 }
  0x3f   : > { %1584 = vmatpush1.bf16.msk.msra.mxu1 %vm1583_vm3, %v1804_v16  ;;  %vm1585_vm6 = vmpackc.low %vm527_vm15, %vm523_vm14  ;;  %vm537_vm14 = vcmp.eq.s32.totalorder %v1930_v11, %v2136_v31  ;;  %vm532_vm3 = vcmp.eq.s32.totalorder %v1927_v10, %v2153_v33 }
  0x40   : > { %1586 = vmatprep.subr.msk.bf16.mxu0 %vm1585_vm6, %v1804_v16  ;;  %vm1617_vm9 = vmpackc.low %vm529_vm2, %vm525_vm1  ;;  %vm534_vm1 = vcmp.eq.s32.totalorder %v1930_v11, %v2144_v32  ;;  %vm539_vm6 = vcmp.eq.s32.totalorder %v1969_v17, %v2127_v30 }
  0x41   : > { %731 = vmatmul.mubr.bf16.vlgmr.msra.gmra.mrb[0].mxu0 %v2164_v34  ;;  %1618 = vmatprep.subr.msk.bf16.mxu1 %vm1617_vm9, %v1804_v16  ;;  %vm1587_vm12 = vmpackc.low %vm526_vm5, %vm522_vm4  ;;  %vm536_vm4 = vcmp.eq.s32.totalorder %v1930_v11, %v2153_v33  ;;  %vm541_vm9 = vcmp.eq.s32.totalorder %v1969_v17, %v2136_v31 }
  0x42   : > { %784 = vmatmul.mubr.bf16.vlgmr.msra.gmra.mrb[0].mxu1 %v2164_v34  ;;  %1588 = vmatpush1.bf16.msk.msra.mxu0 %vm1587_vm12, %v1804_v16  ;;  %vm1619_vm15 = vmpackc.low %vm528_vm8, %vm524_vm7  ;;  %vm543_vm7 = vcmp.eq.s32.totalorder %v1972_v18, %v2127_v30  ;;  %vm538_vm12 = vcmp.eq.s32.totalorder %v1969_v17, %v2144_v32 }
  0x43   : > { %1620 = vmatpush1.bf16.msk.msra.mxu1 %vm1619_vm15, %v1804_v16  ;;  %vm1589_vm2 = vmpackc.low %vm535_vm11, %vm531_vm10  ;;  %740 = vmatprep.mubr.bf16.mxu0 %v1803_v2  ;;  %vm545_vm10 = vcmp.eq.s32.totalorder %v1972_v18, %v2136_v31  ;;  %vm540_vm15 = vcmp.eq.s32.totalorder %v1969_v17, %v2153_v33 }
  0x44   : > { %1590 = vmatprep.subr.msk.bf16.mxu0 %vm1589_vm2, %v1804_v16  ;;  %vm1621_vm5 = vmpackc.low %vm537_vm14, %vm533_vm13  ;;  %793 = vmatprep.mubr.bf16.mxu1 %v1803_v2  ;;  %vm542_vm13 = vcmp.eq.s32.totalorder %v1972_v18, %v2144_v32  ;;  %vm547_vm2 = vcmp.eq.s32.totalorder %v1995_v19, %v2127_v30 }
  0x45   : > { %1622 = vmatprep.subr.msk.bf16.mxu1 %vm1621_vm5, %v1804_v16  ;;  %vm1591_vm8 = vmpackc.low %vm534_vm1, %vm530_vm0  ;;  %vm544_vm0 = vcmp.eq.s32.totalorder %v1972_v18, %v2153_v33  ;;  %vm549_vm5 = vcmp.eq.s32.totalorder %v1995_v19, %v2136_v31 }
  0x46   : > { %1592 = vmatpush1.bf16.msk.msra.mxu0 %vm1591_vm8, %v1804_v16  ;;  %vm1623_vm11 = vmpackc.low %vm536_vm4, %vm532_vm3  ;;  %vm551_vm3 = vcmp.eq.s32.totalorder %v1998_v20, %v2127_v30  ;;  %vm546_vm8 = vcmp.eq.s32.totalorder %v1995_v19, %v2144_v32 }
  0x47   : > { %1624 = vmatpush1.bf16.msk.msra.mxu1 %vm1623_vm11, %v1804_v16  ;;  %vm1593_vm14 = vmpackc.low %vm543_vm7, %vm539_vm6  ;;  %vm553_vm6 = vcmp.eq.s32.totalorder %v1998_v20, %v2136_v31  ;;  %vm548_vm11 = vcmp.eq.s32.totalorder %v1995_v19, %v2153_v33 }
  0x48   : > { %1594 = vmatprep.subr.msk.bf16.mxu0 %vm1593_vm14, %v1804_v16  ;;  %vm1625_vm1 = vmpackc.low %vm545_vm10, %vm541_vm9  ;;  %vm550_vm9 = vcmp.eq.s32.totalorder %v1998_v20, %v2144_v32  ;;  %vm555_vm14 = vcmp.eq.s32.totalorder %v2021_v21, %v2127_v30 }
  0x49   : > { %1626 = vmatprep.subr.msk.bf16.mxu1 %vm1625_vm1, %v1804_v16  ;;  %vm1595_vm4 = vmpackc.low %vm542_vm13, %vm538_vm12  ;;  %741 = vmatmul.mubr.bf16.gmra.mrb[4].mxu0 %v2217_v35  ;;  %vm552_vm12 = vcmp.eq.s32.totalorder %v1998_v20, %v2153_v33  ;;  %vm557_vm1 = vcmp.eq.s32.totalorder %v2021_v21, %v2136_v31 }
  0x4a   : > { %1596 = vmatpush1.bf16.msk.msra.mxu0 %vm1595_vm4, %v1804_v16  ;;  %vm1627_vm7 = vmpackc.low %vm544_vm0, %vm540_vm15  ;;  %794 = vmatmul.mubr.bf16.gmra.mrb[4].mxu1 %v2217_v35  ;;  %vm559_vm15 = vcmp.eq.s32.totalorder %v2024_v22, %v2127_v30  ;;  %vm554_vm4 = vcmp.eq.s32.totalorder %v2021_v21, %v2144_v32 }
  0x4b   : > { %1628 = vmatpush1.bf16.msk.msra.mxu1 %vm1627_vm7, %v1804_v16  ;;  %vm1597_vm10 = vmpackc.low %vm551_vm3, %vm547_vm2  ;;  %836 = vmatprep.mubr.bf16.mxu0 %v1803_v2  ;;  %vm561_vm2 = vcmp.eq.s32.totalorder %v2024_v22, %v2136_v31  ;;  %vm556_vm7 = vcmp.eq.s32.totalorder %v2021_v21, %v2153_v33 }
  0x4c   : > { %1598 = vmatprep.subr.msk.bf16.mxu0 %vm1597_vm10, %v1804_v16  ;;  %vm1629_vm13 = vmpackc.low %vm553_vm6, %vm549_vm5  ;;  %889 = vmatprep.mubr.bf16.mxu1 %v1803_v2  ;;  %vm558_vm5 = vcmp.eq.s32.totalorder %v2024_v22, %v2144_v32  ;;  %vm563_vm10 = vcmp.eq.s32.totalorder %v2047_v23, %v2127_v30 }
  0x4d   : > { %1630 = vmatprep.subr.msk.bf16.mxu1 %vm1629_vm13, %v1804_v16  ;;  %vm1599_vm0 = vmpackc.low %vm550_vm9, %vm546_vm8  ;;  %vm560_vm8 = vcmp.eq.s32.totalorder %v2024_v22, %v2153_v33  ;;  %vm565_vm13 = vcmp.eq.s32.totalorder %v2047_v23, %v2136_v31 }
  0x4e   : > { %1600 = vmatpush1.bf16.msk.msra.mxu0 %vm1599_vm0, %v1804_v16  ;;  %vm1631_vm3 = vmpackc.low %vm552_vm12, %vm548_vm11  ;;  %vm567_vm11 = vcmp.eq.s32.totalorder %v2050_v24, %v2127_v30  ;;  %vm562_vm0 = vcmp.eq.s32.totalorder %v2047_v23, %v2144_v32 }
  0x4f   : > { %1632 = vmatpush1.bf16.msk.msra.mxu1 %vm1631_vm3, %v1804_v16  ;;  %vm1601_vm6 = vmpackc.low %vm559_vm15, %vm555_vm14  ;;  %vm569_vm14 = vcmp.eq.s32.totalorder %v2050_v24, %v2136_v31  ;;  %vm564_vm3 = vcmp.eq.s32.totalorder %v2047_v23, %v2153_v33 }
  0x50   : > { %1602 = vmatprep.subr.msk.bf16.mxu0 %vm1601_vm6, %v1804_v16  ;;  %vm1633_vm9 = vmpackc.low %vm561_vm2, %vm557_vm1  ;;  %vm566_vm1 = vcmp.eq.s32.totalorder %v2050_v24, %v2144_v32  ;;  %vm571_vm6 = vcmp.eq.s32.totalorder %v2073_v25, %v2127_v30 }
  0x51   : > { %1634 = vmatprep.subr.msk.bf16.mxu1 %vm1633_vm9, %v1804_v16  ;;  %vm1603_vm12 = vmpackc.low %vm558_vm5, %vm554_vm4  ;;  %vm568_vm4 = vcmp.eq.s32.totalorder %v2050_v24, %v2153_v33  ;;  %vm573_vm9 = vcmp.eq.s32.totalorder %v2073_v25, %v2136_v31 }
  0x52   : > { %1604 = vmatpush1.bf16.msk.msra.mxu0 %vm1603_vm12, %v1804_v16  ;;  %vm1635_vm15 = vmpackc.low %vm560_vm8, %vm556_vm7  ;;  %vm575_vm7 = vcmp.eq.s32.totalorder %v2076_v26, %v2127_v30  ;;  %vm570_vm12 = vcmp.eq.s32.totalorder %v2073_v25, %v2144_v32 }
  0x53   : > { %1636 = vmatpush1.bf16.msk.msra.mxu1 %vm1635_vm15, %v1804_v16  ;;  %vm1605_vm2 = vmpackc.low %vm567_vm11, %vm563_vm10  ;;  %vm577_vm10 = vcmp.eq.s32.totalorder %v2076_v26, %v2136_v31  ;;  %vm572_vm15 = vcmp.eq.s32.totalorder %v2073_v25, %v2153_v33 }
  0x54   : > { %1606 = vmatprep.subr.msk.bf16.mxu0 %vm1605_vm2, %v1804_v16  ;;  %vm1637_vm5 = vmpackc.low %vm569_vm14, %vm565_vm13  ;;  %vm574_vm13 = vcmp.eq.s32.totalorder %v2076_v26, %v2144_v32  ;;  %vm579_vm2 = vcmp.eq.s32.totalorder %v2099_v27, %v2127_v30 }
  0x55   : > { %1638 = vmatprep.subr.msk.bf16.mxu1 %vm1637_vm5, %v1804_v16  ;;  %vm1607_vm8 = vmpackc.low %vm566_vm1, %vm562_vm0  ;;  %vm576_vm0 = vcmp.eq.s32.totalorder %v2076_v26, %v2153_v33  ;;  %vm581_vm5 = vcmp.eq.s32.totalorder %v2099_v27, %v2136_v31 }
  0x56   : > { %1608 = vmatpush1.bf16.msk.msra.mxu0 %vm1607_vm8, %v1804_v16  ;;  %vm1639_vm11 = vmpackc.low %vm568_vm4, %vm564_vm3  ;;  %vm583_vm3 = vcmp.eq.s32.totalorder %v2102_v28, %v2127_v30  ;;  %vm578_vm8 = vcmp.eq.s32.totalorder %v2099_v27, %v2144_v32 }
  0x57   : > { %1640 = vmatpush1.bf16.msk.msra.mxu1 %vm1639_vm11, %v1804_v16  ;;  %vm1609_vm14 = vmpackc.low %vm575_vm7, %vm571_vm6  ;;  %vm585_vm6 = vcmp.eq.s32.totalorder %v2102_v28, %v2136_v31  ;;  %vm580_vm11 = vcmp.eq.s32.totalorder %v2099_v27, %v2153_v33 }
  0x58   : > { %1610 = vmatprep.subr.msk.bf16.mxu0 %vm1609_vm14, %v1804_v16  ;;  %vm1641_vm1 = vmpackc.low %vm577_vm10, %vm573_vm9  ;;  %vm582_vm9 = vcmp.eq.s32.totalorder %v2102_v28, %v2144_v32 }
  0x59   : > { %1642 = vmatprep.subr.msk.bf16.mxu1 %vm1641_vm1, %v1804_v16  ;;  %vm1611_vm4 = vmpackc.low %vm574_vm13, %vm570_vm12  ;;  %vm584_vm12 = vcmp.eq.s32.totalorder %v2102_v28, %v2153_v33  ;;  %vm1434_vm1 = vcmp.lt.s32.totalorder %v310_v1, 512 }
  0x5a   : > { %1612 = vmatpush1.bf16.msk.msra.mxu0 %vm1611_vm4, %v1804_v16  ;;  %vm1643_vm7 = vmpackc.low %vm576_vm0, %vm572_vm15  ;;  %vm972_vm0 = vcmask 261120  }
  0x5b   : > { %1644 = vmatpush1.bf16.msk.msra.mxu1 %vm1643_vm7, %v1804_v16  ;;  %vm1613_vm10 = vmpackc.low %vm583_vm3, %vm579_vm2 }
  0x5c   : > { %1614 = vmatprep.subr.msk.bf16.mxu0 %vm1613_vm10, %v1804_v16  ;;  %vm1645_vm13 = vmpackc.low %vm585_vm6, %vm581_vm5 }
  0x5d   : > { %1646 = vmatprep.subr.msk.bf16.mxu1 %vm1645_vm13, %v1804_v16  ;;  %vm1615_vm14 = vmpackc.low %vm582_vm9, %vm578_vm8 }
  0x5e   : > { %1616 = vmatpush1.bf16.msk.msra.mxu0 %vm1615_vm14, %v1804_v16  ;;  %vm1647_vm15 = vmpackc.low %vm584_vm12, %vm580_vm11 }
  0x5f   : > { %1648 = vmatpush1.bf16.msk.msra.mxu1 %vm1647_vm15, %v1804_v16 }
  0x61   : > { %837 = vmatmul.mubr.bf16.vlgmr.msra.gmra.mrb[8].mxu0 %v2164_v34 }
  0x62   : > { %890 = vmatmul.mubr.bf16.vlgmr.msra.gmra.mrb[8].mxu1 %v2164_v34  ;;  %846 = vmatprep.mubr.bf16.mxu0 %v1803_v2 }
  0x63   : > { %899 = vmatprep.mubr.bf16.mxu1 %v1803_v2 }
  0x69   : > { %847 = vmatmul.mubr.bf16.gmra.mrb[12].mxu0 %v2217_v35 }
  0x6a   : > { %900 = vmatmul.mubr.bf16.gmra.mrb[12].mxu1 %v2217_v35  ;;  %1011 = vmatprep.mubr.bf16.mxu0 %v1803_v2 }
  0x6b   : > { %1064 = vmatprep.mubr.bf16.mxu1 %v1803_v2 }
  0x92   : > { %v945_v43 = vpop.permute.xlu0 %944  ;;  %v955_v44 = vpop.permute.xlu1 %954 }
 0x114   : > { %v732_v45 = vpop.f32.mrb[0].mxu0 }
 0x115   : > { %v785_v46 = vpop.f32.mrb[0].mxu1  ;;  %v734_v47 = vpop.f32.mrb[1].mxu0 }
 0x116   : > { %v787_v48 = vpop.f32.mrb[1].mxu1  ;;  %v736_v49 = vpop.f32.mrb[2].mxu0 }
 0x117   : > { %v789_v50 = vpop.f32.mrb[2].mxu1  ;;  %v738_v51 = vpop.f32.mrb[3].mxu0 }
 0x118   : > { %v791_v52 = vpop.f32.mrb[3].mxu1 }
 0x11c   : > { %v742_v53 = vpop.f32.mrb[4].mxu0 }
 0x11d   : > { %v795_v54 = vpop.f32.mrb[4].mxu1  ;;  %v744_v55 = vpop.f32.mrb[5].mxu0 }
 0x11e   : > { %v797_v56 = vpop.f32.mrb[5].mxu1  ;;  %v746_v57 = vpop.f32.mrb[6].mxu0 }
 0x11f   : > { %v799_v58 = vpop.f32.mrb[6].mxu1  ;;  %v748_v59 = vpop.f32.mrb[7].mxu0 }
 0x120   : > { %v801_v60 = vpop.f32.mrb[7].mxu1 }
 0x134   : > { %v838_v61 = vpop.f32.mrb[8].mxu0 }
 0x135   : > { %v910_v62 = vmul.f32 %v838_v61, %v732_v45  ;;  %v891_v63 = vpop.f32.mrb[8].mxu1  ;;  %v840_v0 = vpop.f32.mrb[9].mxu0 }
 0x136   : > { %v912_v4 = vmul.f32 %v891_v63, %v785_v46  ;;  %v911_v5 = vmul.f32 %v840_v0, %v734_v47  ;;  %v893_v7 = vpop.f32.mrb[9].mxu1  ;;  %v842_v8 = vpop.f32.mrb[10].mxu0 }
 0x137   : > { %v913_v9 = vmul.f32 %v893_v7, %v787_v48  ;;  %v914_v10 = vmul.f32 %v842_v8, %v736_v49  ;;  %v895_v11 = vpop.f32.mrb[10].mxu1  ;;  %v844_v12 = vpop.f32.mrb[11].mxu0 }
 0x138   : > { %v916_v13 = vmul.f32 %v895_v11, %v789_v50  ;;  %v915_v14 = vmul.f32 %v844_v12, %v738_v51  ;;  %v897_v15 = vpop.f32.mrb[11].mxu1  ;;  %v950_v45 = vpop.permute.xlu0 %949 }
 0x139   : > { %v926_v16 = vpack.c.bf16 %v914_v10, %v910_v62  ;;  %v917_v17 = vmul.f32 %v897_v15, %v791_v52  ;;  %v960_v11 = vpop.permute.xlu1 %959 }
 0x13a   : > { %v928_v18 = vpack.c.bf16 %v916_v13, %v912_v4  ;;  %v927_v19 = vpack.c.bf16 %v915_v14, %v911_v5 }
 0x13b   : > { %v929_v20 = vpack.c.bf16 %v917_v17, %v913_v9 }
 0x13c   : > { %v848_v21 = vpop.f32.mrb[12].mxu0  ;;  %979 = vmatprep.subr.bf16.mxu0 %v927_v19 }
 0x13d   : > { %v918_v22 = vmul.f32 %v848_v21, %v742_v53  ;;  %v901_v23 = vpop.f32.mrb[12].mxu1  ;;  %1032 = vmatprep.subr.bf16.mxu1 %v929_v20  ;;  %v850_v24 = vpop.f32.mrb[13].mxu0  ;;  %980 = vmatpush1.bf16.msra.mxu0 %v926_v16 }
 0x13e   : > { %v920_v25 = vmul.f32 %v901_v23, %v795_v54  ;;  %v919_v26 = vmul.f32 %v850_v24, %v744_v55  ;;  %v903_v27 = vpop.f32.mrb[13].mxu1  ;;  %1033 = vmatpush1.bf16.msra.mxu1 %v928_v18  ;;  %v852_v28 = vpop.f32.mrb[14].mxu0 }
 0x13f   : > { %v921_v29 = vmul.f32 %v903_v27, %v797_v56  ;;  %v922_v30 = vmul.f32 %v852_v28, %v746_v57  ;;  %v905_v31 = vpop.f32.mrb[14].mxu1  ;;  %v854_v32 = vpop.f32.mrb[15].mxu0 }
 0x140   : > { %v924_v33 = vmul.f32 %v905_v31, %v799_v58  ;;  %v923_v34 = vmul.f32 %v854_v32, %v748_v59  ;;  %v907_v35 = vpop.f32.mrb[15].mxu1 }
 0x141   : > { %v930_v36 = vpack.c.bf16 %v922_v30, %v918_v22  ;;  %v925_v37 = vmul.f32 %v907_v35, %v801_v60 }
 0x142   : > { %v932_v38 = vpack.c.bf16 %v924_v33, %v920_v25  ;;  %v931_v39 = vpack.c.bf16 %v923_v34, %v919_v26 }
 0x143   : > { %v933_v40 = vpack.c.bf16 %v925_v37, %v921_v29 }
 0x144   : > { %981 = vmatprep.subr.bf16.mxu0 %v931_v39 }
 0x145   : > { %1034 = vmatprep.subr.bf16.mxu1 %v933_v40  ;;  %982 = vmatpush1.bf16.msra.mxu0 %v930_v36 }
 0x146   : > { %1035 = vmatpush1.bf16.msra.mxu1 %v932_v38 }
 0x148   : > { %1651 = vmatmul.mubr.msk.bf16.vlgmr.msra.gmra.mrb[16].mxu0 %vm972_vm0, %v1719_v41 }
 0x149   : > { %1653 = vmatmul.mubr.msk.bf16.vlgmr.msra.gmra.mrb[16].mxu1 %vm972_vm0, %v1719_v41  ;;  %1021 = vmatprep.mubr.bf16.mxu0 %v1803_v2 }
 0x14a   : > { %1074 = vmatprep.mubr.bf16.mxu1 %v1803_v2 }
 0x150   : > { %1652 = vmatmul.mubr.msk.bf16.gmra.mrb[20].mxu0 %vm972_vm0, %v1720_v42 }
 0x151   : > { %1654 = vmatmul.mubr.msk.bf16.gmra.mrb[20].mxu1 %vm972_vm0, %v1720_v42  ;;  %1185 = vmatprep.mubr.bf16.mxu0 %v1803_v2 }
 0x152   : > { %1238 = vmatprep.mubr.bf16.mxu1 %v1803_v2 }
 0x21b   : > { %v1013_v46 = vpop.f32.mrb[16].mxu0 }
 0x21c   : > { %v1014_v47 = vadd.f32 %v1013_v46, %v945_v43  ;;  %v1066_v48 = vpop.f32.mrb[16].mxu1  ;;  %v1015_v49 = vpop.f32.mrb[17].mxu0 }
 0x21d   : > { %v1067_v50 = vadd.f32 %v1066_v48, %v945_v43  ;;  %v1016_v51 = vadd.f32 %v1015_v49, %v945_v43  ;;  %v1068_v52 = vpop.f32.mrb[17].mxu1  ;;  %v1017_v53 = vpop.f32.mrb[18].mxu0 }
 0x21e   : > { %v1069_v54 = vadd.f32 %v1068_v52, %v945_v43  ;;  %v1018_v55 = vadd.f32 %v1017_v53, %v950_v45  ;;  %v1070_v56 = vpop.f32.mrb[18].mxu1  ;;  %v1019_v57 = vpop.f32.mrb[19].mxu0  ;;  %v1085_v61 = vmax.f32 %v1014_v47, 0.0  ;;  %v1721_v43 = vld [vmem:[%s2456_s4] sm:$0xff]  }
 0x21f   : > { %v1071_v58 = vadd.f32 %v1070_v56, %v950_v45  ;;  %v1020_v59 = vadd.f32 %v1019_v57, %v950_v45  ;;  %v1072_v60 = vpop.f32.mrb[19].mxu1  ;;  %v1087_v0 = vmax.f32 %v1067_v50, 0.0  ;;  %v1086_v4 = vmax.f32 %v1016_v51, 0.0  ;;  %v1125_v46 = vpop.permute.xlu1 %1124 }
 0x220   : > { %v1089_v62 = vmax.f32 %v1018_v55, 0.0  ;;  %v1073_v63 = vadd.f32 %v1072_v60, %v950_v45  ;;  %v1088_v8 = vmax.f32 %v1069_v54, 0.0  ;;  %v1120_v45 = vpop.permute.xlu0 %1119 }
 0x221   : > { %v1091_v5 = vmax.f32 %v1071_v58, 0.0  ;;  %v1090_v7 = vmax.f32 %v1020_v59, 0.0 }
 0x222   : > { %v1101_v9 = vpack.c.bf16 %v1089_v62, %v1085_v61  ;;  %v1092_v10 = vmax.f32 %v1073_v63, 0.0 }
 0x223   : > { %v1103_v12 = vpack.c.bf16 %v1091_v5, %v1087_v0  ;;  %v1102_v13 = vpack.c.bf16 %v1090_v7, %v1086_v4  ;;  %v1023_v14 = vpop.f32.mrb[20].mxu0 }
 0x224   : > { %v1104_v15 = vpack.c.bf16 %v1092_v10, %v1088_v8  ;;  %v1024_v16 = vadd.f32 %v1023_v14, %v955_v44  ;;  %v1076_v17 = vpop.f32.mrb[20].mxu1  ;;  %v1025_v18 = vpop.f32.mrb[21].mxu0 }
 0x225   : > { %v1077_v19 = vadd.f32 %v1076_v17, %v955_v44  ;;  %v1026_v20 = vadd.f32 %v1025_v18, %v955_v44  ;;  %v1078_v21 = vpop.f32.mrb[21].mxu1  ;;  %v1027_v22 = vpop.f32.mrb[22].mxu0  ;;  %1153 = vmatprep.subr.bf16.mxu0 %v1102_v13 }
 0x226   : > { %v1079_v23 = vadd.f32 %v1078_v21, %v955_v44  ;;  %v1028_v24 = vadd.f32 %v1027_v22, %v960_v11  ;;  %v1080_v25 = vpop.f32.mrb[22].mxu1  ;;  %1206 = vmatprep.subr.bf16.mxu1 %v1104_v15  ;;  %v1029_v26 = vpop.f32.mrb[23].mxu0  ;;  %1154 = vmatpush1.bf16.msra.mxu0 %v1101_v9  ;;  %v1093_v30 = vmax.f32 %v1024_v16, 0.0  ;;  %v1722_v44 = vld [vmem:[%s2456_s4 + $0x8] sm:$0xff]  }
 0x227   : > { %v1081_v27 = vadd.f32 %v1080_v25, %v960_v11  ;;  %v1030_v28 = vadd.f32 %v1029_v26, %v960_v11  ;;  %v1082_v29 = vpop.f32.mrb[23].mxu1  ;;  %1207 = vmatpush1.bf16.msra.mxu1 %v1103_v12  ;;  %v1095_v33 = vmax.f32 %v1077_v19, 0.0  ;;  %v1094_v34 = vmax.f32 %v1026_v20, 0.0  ;;  %v1130_v8 = vpop.permute.xlu0 %1129 }
 0x228   : > { %v1097_v31 = vmax.f32 %v1028_v24, 0.0  ;;  %v1083_v32 = vadd.f32 %v1082_v29, %v960_v11  ;;  %v1096_v37 = vmax.f32 %v1079_v23, 0.0  ;;  %v1135_v12 = vpop.permute.xlu1 %1134 }
 0x229   : > { %v1099_v35 = vmax.f32 %v1081_v27, 0.0  ;;  %v1098_v36 = vmax.f32 %v1030_v28, 0.0 }
 0x22a   : > { %v1105_v38 = vpack.c.bf16 %v1097_v31, %v1093_v30  ;;  %v1100_v39 = vmax.f32 %v1083_v32, 0.0 }
 0x22b   : > { %v1107_v40 = vpack.c.bf16 %v1099_v35, %v1095_v33  ;;  %v1106_v41 = vpack.c.bf16 %v1098_v36, %v1094_v34 }
 0x22c   : > { %v1108_v42 = vpack.c.bf16 %v1100_v39, %v1096_v37 }
 0x22d   : > { %1155 = vmatprep.subr.bf16.mxu0 %v1106_v41 }
 0x22e   : > { %1208 = vmatprep.subr.bf16.mxu1 %v1108_v42  ;;  %1156 = vmatpush1.bf16.msra.mxu0 %v1105_v38 }
 0x22f   : > { %1209 = vmatpush1.bf16.msra.mxu1 %v1107_v40 }
 0x231   : > { %1657 = vmatmul.mubr.msk.bf16.vlgmr.msra.gmra.mrb[24].mxu0 %vm972_vm0, %v1721_v43 }
 0x232   : > { %1659 = vmatmul.mubr.msk.bf16.vlgmr.msra.gmra.mrb[24].mxu1 %vm972_vm0, %v1721_v43  ;;  %1195 = vmatprep.mubr.bf16.mxu0 %v1803_v2 }
 0x233   : > { %1248 = vmatprep.mubr.bf16.mxu1 %v1803_v2 }
 0x239   : > { %1658 = vmatmul.mubr.msk.bf16.gmra.mrb[28].mxu0 %vm972_vm0, %v1722_v44 }
 0x23a   : > { %1660 = vmatmul.mubr.msk.bf16.gmra.mrb[28].mxu1 %vm972_vm0, %v1722_v44  ;;  %1329 = vmatprep.mubr.bf16.mxu0 %v1803_v2  ;;  %v1283_v44 = vld [vmem:[%s2458_s6] sm:$0x1] }
 0x23b   : > { %1370 = vmatprep.mubr.bf16.mxu1 %v1803_v2 }
 0x304   : > { %v1187_v47 = vpop.f32.mrb[24].mxu0 }
 0x305   : > { %v1188_v48 = vadd.f32 %v1187_v47, %v1120_v45  ;;  %v1240_v49 = vpop.f32.mrb[24].mxu1  ;;  %v1189_v50 = vpop.f32.mrb[25].mxu0 }
 0x306   : > { %v1241_v51 = vadd.f32 %v1240_v49, %v1120_v45  ;;  %v1190_v52 = vadd.f32 %v1189_v50, %v1120_v45  ;;  %v1242_v53 = vpop.f32.mrb[25].mxu1  ;;  %v1191_v54 = vpop.f32.mrb[26].mxu0 }
 0x307   : > { %v1243_v55 = vadd.f32 %v1242_v53, %v1120_v45  ;;  %v1192_v56 = vadd.f32 %v1191_v54, %v1125_v46  ;;  %v1244_v57 = vpop.f32.mrb[26].mxu1  ;;  %v1193_v58 = vpop.f32.mrb[27].mxu0  ;;  %v1259_v62 = vmax.f32 %v1188_v48, 0.0 }
 0x308   : > { %v1245_v59 = vadd.f32 %v1244_v57, %v1125_v46  ;;  %v1194_v60 = vadd.f32 %v1193_v58, %v1125_v46  ;;  %v1246_v61 = vpop.f32.mrb[27].mxu1  ;;  %v1261_v0 = vmax.f32 %v1241_v51, 0.0  ;;  %v1260_v4 = vmax.f32 %v1190_v52, 0.0  ;;  %v1288_v45 = vpop.permute.xlu0 %1287 }
 0x309   : > { %v1263_v63 = vmax.f32 %v1192_v56, 0.0  ;;  %v1247_v2 = vadd.f32 %v1246_v61, %v1125_v46  ;;  %v1262_v9 = vmax.f32 %v1243_v55, 0.0  ;;  %v1293_v46 = vrot.slane %v1288_v45, %v1914_v6 }
 0x30a   : > { %v1265_v5 = vmax.f32 %v1245_v59, 0.0  ;;  %v1264_v7 = vmax.f32 %v1194_v60, 0.0 }
 0x30b   : > { %v1275_v10 = vpack.c.bf16 %v1263_v63, %v1259_v62  ;;  %v1266_v11 = vmax.f32 %v1247_v2, 0.0 }
 0x30c   : > { %v1277_v13 = vpack.c.bf16 %v1265_v5, %v1261_v0  ;;  %v1276_v14 = vpack.c.bf16 %v1264_v7, %v1260_v4  ;;  %v1197_v15 = vpop.f32.mrb[28].mxu0 }
 0x30d   : > { %v1278_v16 = vpack.c.bf16 %v1266_v11, %v1262_v9  ;;  %v1198_v17 = vadd.f32 %v1197_v15, %v1130_v8  ;;  %v1250_v18 = vpop.f32.mrb[28].mxu1  ;;  %v1199_v19 = vpop.f32.mrb[29].mxu0  ;;  %v1805_v9 = vmov 1966171168  }
 0x30e   : > { %v1251_v20 = vadd.f32 %v1250_v18, %v1130_v8  ;;  %v1200_v21 = vadd.f32 %v1199_v19, %v1130_v8  ;;  %v1252_v22 = vpop.f32.mrb[29].mxu1  ;;  %v1201_v23 = vpop.f32.mrb[30].mxu0  ;;  %1297 = vmatprep.subr.bf16.mxu0 %v1276_v14 }
 0x30f   : > { %v1253_v24 = vadd.f32 %v1252_v22, %v1130_v8  ;;  %v1202_v25 = vadd.f32 %v1201_v23, %v1135_v12  ;;  %v1254_v26 = vpop.f32.mrb[30].mxu1  ;;  %1338 = vmatprep.subr.bf16.mxu1 %v1278_v16  ;;  %v1203_v27 = vpop.f32.mrb[31].mxu0  ;;  %1298 = vmatpush1.bf16.msra.mxu0 %v1275_v10  ;;  %v1267_v31 = vmax.f32 %v1198_v17, 0.0  ;;  %v1410_v10 = vunpack.c.l.s4 %v1805_v9 }
 0x310   : > { %v1255_v28 = vadd.f32 %v1254_v26, %v1135_v12  ;;  %v1204_v29 = vadd.f32 %v1203_v27, %v1135_v12  ;;  %v1256_v30 = vpop.f32.mrb[31].mxu1  ;;  %1339 = vmatpush1.bf16.msra.mxu1 %v1277_v13  ;;  %v1269_v34 = vmax.f32 %v1251_v20, 0.0  ;;  %v1268_v35 = vmax.f32 %v1200_v21, 0.0 }
 0x311   : > { %v1271_v32 = vmax.f32 %v1202_v25, 0.0  ;;  %v1257_v33 = vadd.f32 %v1256_v30, %v1135_v12  ;;  %v1270_v38 = vmax.f32 %v1253_v24, 0.0  ;;  %v1411_v11 = vunpack.c.0.s8 %v1410_v10 }
 0x312   : > { %v1273_v36 = vmax.f32 %v1255_v28, 0.0  ;;  %v1272_v37 = vmax.f32 %v1204_v29, 0.0 }
 0x313   : > { %v1279_v39 = vpack.c.bf16 %v1271_v32, %v1267_v31  ;;  %v1274_v40 = vmax.f32 %v1257_v33, 0.0  ;;  %v1414_v14 = vsub.s32 %v1411_v11, %v1907_v3 }
 0x314   : > { %v1281_v41 = vpack.c.bf16 %v1273_v36, %v1269_v34  ;;  %v1280_v42 = vpack.c.bf16 %v1272_v37, %v1268_v35 }
 0x315   : > { %v1282_v43 = vpack.c.bf16 %v1274_v40, %v1270_v38 }
 0x316   : > { %1299 = vmatprep.subr.bf16.mxu0 %v1280_v42 }
 0x317   : > { %1340 = vmatprep.subr.bf16.mxu1 %v1282_v43  ;;  %1300 = vmatpush1.bf16.msra.mxu0 %v1279_v39 }
 0x318   : > { %1341 = vmatpush1.bf16.msra.mxu1 %v1281_v41 }
 0x31a   : > { %1661 = vmatmul.mubr.msk.bf16.vlgmr.msra.gmra.mrb[32].mxu0 %vm972_vm0, %v1283_v44 }
 0x31b   : > { %1662 = vmatmul.mubr.msk.bf16.vlgmr.msra.gmra.mrb[32].mxu1 %vm972_vm0, %v1283_v44 }
 0x3ed   : > { %v1331_v47 = vpop.f32.mrb[32].mxu0 }
 0x3ee   : > { %v1332_v48 = vadd.f32 %v1331_v47, %v1293_v46  ;;  %v1372_v49 = vpop.f32.mrb[32].mxu1  ;;  %v1333_v50 = vpop.f32.mrb[33].mxu0 }
 0x3ef   : > { %v1373_v51 = vadd.f32 %v1372_v49, %v1293_v46  ;;  %v1334_v52 = vadd.f32 %v1333_v50, %v1293_v46  ;;  %v1374_v53 = vpop.f32.mrb[33].mxu1  ;;  %v1335_v54 = vpop.f32.mrb[34].mxu0 }
 0x3f0   : > { %v1663_v55 = vmul.f32 -1.442695, %v1332_v48  ;;  %v1375_v56 = vadd.f32 %v1374_v53, %v1293_v46  ;;  %v1376_v57 = vpop.f32.mrb[34].mxu1  ;;  %v1336_v58 = vpop.f32.mrb[35].mxu0 }
 0x3f1   : > { %v1665_v59 = vmul.f32 -1.442695, %v1373_v51  ;;  %v1664_v60 = vmul.f32 -1.442695, %v1334_v52  ;;  %v1377_v61 = vpop.f32.mrb[35].mxu1 }
 0x3f2   : > { %1723 = vpow2.f32 %v1663_v55  ;;  %v1666_v62 = vmul.f32 -1.442695, %v1375_v56 }
 0x3f3   : > { %1725 = vpow2.f32 %v1665_v59 }
 0x3f4   : > { %1727 = vpow2.f32 %v1664_v60 }
 0x3f5   : > { %1729 = vpow2.f32 %v1666_v62 }
 0x3fc   : > { %v1724_v6 = vpop.eup %1723 }
 0x3fd   : > { %v1726_v63 = vpop.eup %1725  ;;  %v1391_v2 = vadd.f32 1.0, %v1724_v6 }
 0x3fe   : > { %v1728_v0 = vpop.eup %1727  ;;  %v1393_v4 = vadd.f32 1.0, %v1726_v63 }
 0x3ff   : > { %v1730_v5 = vpop.eup %1729  ;;  %1731 = vrcp.f32 %v1391_v2  ;;  %v1392_v7 = vadd.f32 1.0, %v1728_v0 }
 0x400   : > { %1733 = vrcp.f32 %v1393_v4  ;;  %v1394_v8 = vadd.f32 1.0, %v1730_v5 }
 0x401   : > { %1735 = vrcp.f32 %v1392_v7 }
 0x402   : > { %1737 = vrcp.f32 %v1394_v8 }
 0x409   : > { %v1732_v12 = vpop.eup %1731 }
 0x40a   : > { %v1734_v13 = vpop.eup %1733 }
 0x40b   : > { %v1736_v15 = vpop.eup %1735 }
 0x40c   : > { %v1738_v16 = vpop.eup %1737  ;;  %v1407_v17 = vcombine.low %v1732_v12, %v1736_v15 }
 0x40d   : > { %v1408_v18 = vcombine.low %v1734_v13, %v1738_v16 }
 0x40e   : > { %v1415_v19 = vrot.slane %v1407_v17, %v1414_v14 }
 0x40f   : > { %v1422_v20 = vrot.slane %v1408_v18, %v1414_v14 }
 0x411   : > { %v1423_v21 = vcombine.low %v1415_v19, %v1422_v20 }
 0x413   : > { %v1430_v22 = vrot.slane %v1423_v21, %v1414_v14 }
 0x415   : > { %1436 = vst.msk [vmem:[%s301_s28] sm:$0xf] %vm1434_vm1, %v1430_v22 }
 0x416   : > { %1752 = shalt.err (!%p1749_p3)
}
 0x417   : > { %s1753_s23 = scalar_lea.hbm %s2410_s18, 64  ;;  %s1757_s26 = scalar_lea.hbm %s2460_s8, 128 }
 0x418   : > { %p1754_p4 = scmp.ne.s32.totalorder %s2410_s18, %s1753_s23  ;;  %p1758_p9 = scmp.lt.u32.totalorder %s2410_s18, %s2460_s8 }
 0x419   : > { %p1759_p10 = scmp.lt.u32.totalorder %s1757_s26, %s1753_s23  ;;  %p1761_p12 = scmp.lt.u32.totalorder %s1753_s23, %s2410_s18 }
 0x41a   : > { %p1755_p7 = pnand %p1754_p4, %p1893_p5 }
 0x41b   : > { %p1760_p11 = por %p1759_p10, %p1758_p9 }
 0x41c   : > { %p1756_p8 = pneg %p1755_p7 }
 0x41d   : > { %p1762_p13 = por %p1761_p12, %p1760_p11 }
 0x41f   : > { %p1763_p0 = pnand %p1762_p13, %p1756_p8 }
 0x421   : > { %1766 = shalt.err (!%p1763_p0)
}
 0x422   : > { %1673 = dma.vmem_to_hbm [thread:$0]  (%p1893_p5), %s2412_s11, 64, %s2410_s18, %s1438_s19  }
 0x423 PF: > { %p1679_p1 = scmp.ge.s32.totalorder %s1801_s10, 2  ;;  %s1464_s13 = sand.u32 1, %s1789_s29  }
 0x424   : > { %s1465_s14 = scalar_lea.sflag [#allocation4], %s1464_s13 }
 0x425   : > { %p1676_p2 = pnand %p1679_p1, %p1897_p6 }
 0x427   : > { %1784 = dma.done.wait (!%p1676_p2), %s1465_s14, 64  }
 0x428   : > { %1786 = vsyncadd (!%p1676_p2), %s1465_s14, 4294967232  ;;  %p20_p3 = scmp.ge.s32.totalorder %s1880_s12, 4   ;;  %s2463_s29 = smov %s1793_s30 }
 0x429   : > { %s2464_s30 = smov %s1797_s9  ;;  %s2465_s9 = smov %s1891_s15 }
 0x42a   : > { %s2466_s10 = smov %s1880_s12  ;;  %22 = sbr.rel (!%p20_p3) target bundleno = 6 (0x6), region = 88 }
 0x431   :  { %1470 = vsyncpa [#allocation4], 1 }
 0x432   :  { %1472 = vsyncpa [#allocation4 + $0x1], 1 }

</bundles_post_ra>
